<compile_context>
chip_gen: v7x
topology: tpu7x:2x2x1
jax: 0.10.0
libtpu: 0.0.40
codegen_flags: <defaults>
</compile_context>

<pallas_src>
import jax
import jax.numpy as jnp
from jax.experimental import pallas as pl
from jax.experimental.pallas import tpu as pltpu


# ----------------------------- configuration --------------------------------
B = 8                      # batch
J = 6                      # joints
ROT_SHAPE = (J, 4)         # batch['rot']  -> flattens to 24
POS_SHAPE = (J, 3)         # batch['pos']  -> flattens to 18
UNITS = (32, 32)           # mconfig.units  (acti = ReLU, norm = LayerNorm)
TORQUE_SHAPE = (J, 3)      # outdim_id['torque'] -> 18
GRF_SHAPE = (2, 3)         # outdim_id['grf']    -> 6
LN_EPS = 1e-5

ROT_DIM = ROT_SHAPE[0] * ROT_SHAPE[1]                                        # 24
POS_DIM = POS_SHAPE[0] * POS_SHAPE[1]                                        # 18
IN_DIM = ROT_DIM + POS_DIM                                                   # 42
OUT_DIM = TORQUE_SHAPE[0] * TORQUE_SHAPE[1] + GRF_SHAPE[0] * GRF_SHAPE[1]    # 24
H = UNITS[0]                                                                 # 32
LANES = 128

# ---- packed parameter slab layout (rows of a (SLAB_ROWS, 128) f32 array) ----
R_W1R = 0                  # w1 rot-part   rows [0, 24)   valid cols [0, 32)
R_W1P = ROT_DIM            # w1 pos-part   rows [24, 42)  valid cols [0, 32)
R_W2 = 48                  # w2 (padded)   rows [48, 176) valid [48:80, 0:32)
R_WH = R_W2 + LANES        # wh (padded)   rows [176,304) valid [176:208, 0:24)
R_VEC = R_WH + LANES       # 7 row-vectors: b1,g1,be1,b2,g2,be2,bh at 304..310
SLAB_ROWS = R_VEC + 8      # 312 (multiple of 8)


# ------------------------------- Pallas kernel -------------------------------
def _idfd_id_kernel(rot_ref, pos_ref, p_ref, out_ref):
    """Fused ID MLP: (Linear -> ReLU -> LayerNorm) x2 -> ID_head Linear.

    All activations are lane-dense (B, 128); padded lanes are exactly zero.
    """
    rot = rot_ref[...]                                   # (B, 24)
    pos = pos_ref[...]                                   # (B, 18)

    # static slices of the packed param slab (zero-cost views)
    w1r = p_ref[R_W1R:R_W1R + ROT_DIM, :]                # (24, 128)
    w1p = p_ref[R_W1P:R_W1P + POS_DIM, :]                # (18, 128)
    w2 = p_ref[R_W2:R_W2 + LANES, :]                     # (128, 128)
    wh = p_ref[R_WH:R_WH + LANES, :]                     # (128, 128)
    b1 = p_ref[R_VEC + 0:R_VEC + 1, :]                   # (1, 128)
    g1 = p_ref[R_VEC + 1:R_VEC + 2, :]
    be1 = p_ref[R_VEC + 2:R_VEC + 3, :]
    b2 = p_ref[R_VEC + 3:R_VEC + 4, :]
    g2 = p_ref[R_VEC + 4:R_VEC + 5, :]
    be2 = p_ref[R_VEC + 5:R_VEC + 6, :]
    bh = p_ref[R_VEC + 6:R_VEC + 7, :]

    inv_n = jnp.float32(1.0 / H)                         # real feature count

    def relu_layernorm(pre, g, be):
        h = jnp.maximum(pre, 0.0)
        # padded lanes of h are exactly 0, so full-lane sums equal sums over
        # the real 32 features; one data pass for mean and E[h^2].
        mean = jnp.sum(h, axis=-1, keepdims=True) * inv_n
        var = jnp.sum(h * h, axis=-1, keepdims=True) * inv_n - mean * mean
        scale = g * jax.lax.rsqrt(var + LN_EPS)          # gamma folded; g pad = 0
        return (h - mean) * scale + be                   # padded lanes stay 0

    # layer 1: fused concat via split weight (two dots) + bias
    h = (jnp.dot(rot, w1r, preferred_element_type=jnp.float32)
         + jnp.dot(pos, w1p, preferred_element_type=jnp.float32) + b1)
    h = relu_layernorm(h, g1, be1)

    # layer 2
    h = relu_layernorm(
        jnp.dot(h, w2, preferred_element_type=jnp.float32) + b2, g2, be2)

    # ID_head (output padded to 128 lanes -> unmasked store)
    out_ref[...] = (jnp.dot(h, wh, preferred_element_type=jnp.float32)
                    + bh).astype(out_ref.dtype)


# ------------------------------ param packing --------------------------------
def pack_params(p):
    """Pack the 10 parameter tensors into one lane-dense (SLAB_ROWS, 128) slab."""
    slab = jnp.zeros((SLAB_ROWS, LANES), jnp.float32)
    slab = slab.at[R_W1R:R_W1R + ROT_DIM, 0:H].set(p['w1'][:ROT_DIM, :])
    slab = slab.at[R_W1P:R_W1P + POS_DIM, 0:H].set(p['w1'][ROT_DIM:, :])
    slab = slab.at[R_W2:R_W2 + H, 0:H].set(p['w2'])
    slab = slab.at[R_WH:R_WH + H, 0:OUT_DIM].set(p['wh'])
    slab = slab.at[R_VEC + 0, 0:H].set(p['b1'][0])
    slab = slab.at[R_VEC + 1, 0:H].set(p['g1'][0])
    slab = slab.at[R_VEC + 2, 0:H].set(p['be1'][0])
    slab = slab.at[R_VEC + 3, 0:H].set(p['b2'][0])
    slab = slab.at[R_VEC + 4, 0:H].set(p['g2'][0])
    slab = slab.at[R_VEC + 5, 0:H].set(p['be2'][0])
    slab = slab.at[R_VEC + 6, 0:OUT_DIM].set(p['bh'][0])
    return slab


# ------------------------------ forward wrapper -------------------------------
@jax.jit
def idfd_forward(batch, param_slab):
    """Eval-mode IDFD.forward: returns {'torque': (B,J,3), 'grf': (B,2,3)}."""
    bsz = batch['rot'].shape[0]
    rot = batch['rot'].reshape(bsz, -1)        # flatten(1) — layout-only, cheap
    pos = batch['pos'].reshape(bsz, -1)

    vmem = pl.BlockSpec(memory_space=pltpu.MemorySpace.VMEM)
    y = pl.pallas_call(
        _idfd_id_kernel,
        out_shape=jax.ShapeDtypeStruct((bsz, LANES), jnp.float32),
        in_specs=[vmem, vmem, vmem],
        out_specs=vmem,
    )(rot, pos, param_slab)

    # split head output per outkeys_id ('torque', 'grf'), identity postprocess
    d_tor = TORQUE_SHAPE[0] * TORQUE_SHAPE[1]
    d_grf = GRF_SHAPE[0] * GRF_SHAPE[1]
    torque = y[:, :d_tor].reshape(bsz, *TORQUE_SHAPE)
    grf = y[:, d_tor:d_tor + d_grf].reshape(bsz, *GRF_SHAPE)
    return {'torque': torque, 'grf': grf}


# ------------------------------ param init -----------------------------------
def _linear_init(key, fan_in, fan_out):
    """PyTorch nn.Linear default: U(-1/sqrt(fan_in), 1/sqrt(fan_in))."""
    kw, kb = jax.random.split(key)
    bound = 1.0 / jnp.sqrt(jnp.float32(fan_in))
    w = jax.random.uniform(kw, (fan_in, fan_out), jnp.float32, -bound, bound)
    b = jax.random.uniform(kb, (1, fan_out), jnp.float32, -bound, bound)
    return w, b


def init_params(key):
    k1, k2, k3 = jax.random.split(key, 3)
    w1, b1 = _linear_init(k1, IN_DIM, UNITS[0])
    w2, b2 = _linear_init(k2, UNITS[0], UNITS[1])
    wh, bh = _linear_init(k3, UNITS[1], OUT_DIM)
    return {
        'w1': w1, 'b1': b1,
        'g1': jnp.ones((1, UNITS[0]), jnp.float32),
        'be1': jnp.zeros((1, UNITS[0]), jnp.float32),
        'w2': w2, 'b2': b2,
        'g2': jnp.ones((1, UNITS[1]), jnp.float32),
        'be2': jnp.zeros((1, UNITS[1]), jnp.float32),
        'wh': wh, 'bh': bh,
    }


# --------------------------- pure-JAX reference -------------------------------
def _reference(batch, p):
    bsz = batch['rot'].shape[0]
    x = jnp.concatenate(
        [batch['rot'].reshape(bsz, -1), batch['pos'].reshape(bsz, -1)], axis=-1)

    def layer(h, w, b, g, be):
        h = jnp.maximum(h @ w + b, 0.0)
        mean = jnp.mean(h, -1, keepdims=True)
        var = jnp.mean((h - mean) ** 2, -1, keepdims=True)
        return (h - mean) * jax.lax.rsqrt(var + LN_EPS) * g + be

    h = layer(x, p['w1'], p['b1'], p['g1'], p['be1'])
    h = layer(h, p['w2'], p['b2'], p['g2'], p['be2'])
    y = h @ p['wh'] + p['bh']
    d_tor = TORQUE_SHAPE[0] * TORQUE_SHAPE[1]
    return {'torque': y[:, :d_tor].reshape(bsz, *TORQUE_SHAPE),
            'grf': y[:, d_tor:].reshape(bsz, *GRF_SHAPE)}


# ------------------------------------ main ------------------------------------
if __name__ == "__main__":
    key = jax.random.PRNGKey(0)
    k_rot, k_pos, k_param = jax.random.split(key, 3)

    batch = {
        'rot': jax.random.normal(k_rot, (B, *ROT_SHAPE), jnp.float32),
        'pos': jax.random.normal(k_pos, (B, *POS_SHAPE), jnp.float32),
    }
    params = init_params(k_param)
    param_slab = jax.block_until_ready(pack_params(params))   # packed once

    out = idfd_forward(batch, param_slab)
    out = jax.block_until_ready(out)

    ref = _reference(batch, params)
    assert out['torque'].shape == (B, *TORQUE_SHAPE)
    assert out['grf'].shape == (B, *GRF_SHAPE)
    assert jnp.allclose(out['torque'], ref['torque'], atol=1e-4, rtol=1e-4)
    assert jnp.allclose(out['grf'], ref['grf'], atol=1e-4, rtol=1e-4)

    print("KERNEL_OK")
</pallas_src>

<mosaic_0001>
module attributes {stable_mosaic.version = 11 : i64} {
  func.func @_idfd_id_kernel(%arg0: memref<8x24xf32, #tpu.memory_space<vmem>>, %arg1: memref<8x18xf32, #tpu.memory_space<vmem>>, %arg2: memref<312x128xf32, #tpu.memory_space<vmem>>, %arg3: memref<8x128xf32, #tpu.memory_space<vmem>>) attributes {dimension_semantics = [], scalar_prefetch = 0 : i64, scratch_operands = 0 : i64, tpu.core_type = #tpu.core_type<tc>} {
    %c0 = arith.constant 0 : index
    %c0_0 = arith.constant 0 : index
    %0 = vector.load %arg0[%c0, %c0_0] : memref<8x24xf32, #tpu.memory_space<vmem>>, vector<8x24xf32>
    %c0_1 = arith.constant 0 : index
    %c0_2 = arith.constant 0 : index
    %1 = vector.load %arg1[%c0_1, %c0_2] : memref<8x18xf32, #tpu.memory_space<vmem>>, vector<8x18xf32>
    %c0_3 = arith.constant 0 : index
    %c0_4 = arith.constant 0 : index
    %2 = vector.load %arg2[%c0_3, %c0_4] : memref<312x128xf32, #tpu.memory_space<vmem>>, vector<24x128xf32>
    %c24 = arith.constant 24 : index
    %c0_5 = arith.constant 0 : index
    %3 = vector.load %arg2[%c24, %c0_5] : memref<312x128xf32, #tpu.memory_space<vmem>>, vector<18x128xf32>
    %c48 = arith.constant 48 : index
    %c0_6 = arith.constant 0 : index
    %4 = vector.load %arg2[%c48, %c0_6] : memref<312x128xf32, #tpu.memory_space<vmem>>, vector<128x128xf32>
    %c176 = arith.constant 176 : index
    %c0_7 = arith.constant 0 : index
    %5 = vector.load %arg2[%c176, %c0_7] : memref<312x128xf32, #tpu.memory_space<vmem>>, vector<128x128xf32>
    %c304 = arith.constant 304 : index
    %c0_8 = arith.constant 0 : index
    %6 = vector.load %arg2[%c304, %c0_8] : memref<312x128xf32, #tpu.memory_space<vmem>>, vector<1x128xf32>
    %c305 = arith.constant 305 : index
    %c0_9 = arith.constant 0 : index
    %7 = vector.load %arg2[%c305, %c0_9] : memref<312x128xf32, #tpu.memory_space<vmem>>, vector<1x128xf32>
    %c306 = arith.constant 306 : index
    %c0_10 = arith.constant 0 : index
    %8 = vector.load %arg2[%c306, %c0_10] : memref<312x128xf32, #tpu.memory_space<vmem>>, vector<1x128xf32>
    %c307 = arith.constant 307 : index
    %c0_11 = arith.constant 0 : index
    %9 = vector.load %arg2[%c307, %c0_11] : memref<312x128xf32, #tpu.memory_space<vmem>>, vector<1x128xf32>
    %c308 = arith.constant 308 : index
    %c0_12 = arith.constant 0 : index
    %10 = vector.load %arg2[%c308, %c0_12] : memref<312x128xf32, #tpu.memory_space<vmem>>, vector<1x128xf32>
    %c309 = arith.constant 309 : index
    %c0_13 = arith.constant 0 : index
    %11 = vector.load %arg2[%c309, %c0_13] : memref<312x128xf32, #tpu.memory_space<vmem>>, vector<1x128xf32>
    %c310 = arith.constant 310 : index
    %c0_14 = arith.constant 0 : index
    %12 = vector.load %arg2[%c310, %c0_14] : memref<312x128xf32, #tpu.memory_space<vmem>>, vector<1x128xf32>
    %cst = arith.constant dense<0.000000e+00> : vector<8x128xf32>
    %13 = tpu.matmul %0, %2, %cst {dimension_numbers = #tpu.dot_dimension_numbers<[1], [0], [0], [1], [0, 0, 1, 1], [], []>} : vector<8x24xf32>, vector<24x128xf32>, vector<8x128xf32> -> vector<8x128xf32>
    %cst_15 = arith.constant dense<0.000000e+00> : vector<8x128xf32>
    %14 = tpu.matmul %1, %3, %cst_15 {dimension_numbers = #tpu.dot_dimension_numbers<[1], [0], [0], [1], [0, 0, 1, 1], [], []>} : vector<8x18xf32>, vector<18x128xf32>, vector<8x128xf32> -> vector<8x128xf32>
    %15 = arith.addf %13, %14 : vector<8x128xf32>
    %16 = vector.broadcast %6 : vector<1x128xf32> to vector<8x128xf32>
    %17 = arith.addf %15, %16 : vector<8x128xf32>
    %cst_16 = arith.constant 0.000000e+00 : f32
    %18 = vector.broadcast %cst_16 : f32 to vector<8x128xf32>
    %19 = arith.maximumf %17, %18 : vector<8x128xf32>
    %cst_17 = arith.constant dense<0.000000e+00> : vector<8xf32>
    %20 = vector.multi_reduction <add>, %19, %cst_17 [1] : vector<8x128xf32> to vector<8xf32>
    %21 = vector.shape_cast %20 : vector<8xf32> to vector<8x1xf32>
    %cst_18 = arith.constant 3.125000e-02 : f32
    %22 = vector.broadcast %cst_18 : f32 to vector<8x1xf32>
    %23 = arith.mulf %21, %22 : vector<8x1xf32>
    %24 = arith.mulf %19, %19 : vector<8x128xf32>
    %cst_19 = arith.constant dense<0.000000e+00> : vector<8xf32>
    %25 = vector.multi_reduction <add>, %24, %cst_19 [1] : vector<8x128xf32> to vector<8xf32>
    %26 = vector.shape_cast %25 : vector<8xf32> to vector<8x1xf32>
    %cst_20 = arith.constant 3.125000e-02 : f32
    %27 = vector.broadcast %cst_20 : f32 to vector<8x1xf32>
    %28 = arith.mulf %26, %27 : vector<8x1xf32>
    %29 = arith.mulf %23, %23 : vector<8x1xf32>
    %30 = arith.subf %28, %29 : vector<8x1xf32>
    %cst_21 = arith.constant 9.99999974E-6 : f32
    %31 = vector.broadcast %cst_21 : f32 to vector<8x1xf32>
    %32 = arith.addf %30, %31 : vector<8x1xf32>
    %33 = math.rsqrt %32 : vector<8x1xf32>
    %34 = vector.broadcast %7 : vector<1x128xf32> to vector<8x128xf32>
    %35 = vector.broadcast %33 : vector<8x1xf32> to vector<8x128xf32>
    %36 = arith.mulf %34, %35 : vector<8x128xf32>
    %37 = vector.broadcast %23 : vector<8x1xf32> to vector<8x128xf32>
    %38 = arith.subf %19, %37 : vector<8x128xf32>
    %39 = arith.mulf %38, %36 : vector<8x128xf32>
    %40 = vector.broadcast %8 : vector<1x128xf32> to vector<8x128xf32>
    %41 = arith.addf %39, %40 : vector<8x128xf32>
    %cst_22 = arith.constant dense<0.000000e+00> : vector<8x128xf32>
    %42 = tpu.matmul %41, %4, %cst_22 {dimension_numbers = #tpu.dot_dimension_numbers<[1], [0], [0], [1], [0, 0, 1, 1], [], []>} : vector<8x128xf32>, vector<128x128xf32>, vector<8x128xf32> -> vector<8x128xf32>
    %43 = vector.broadcast %9 : vector<1x128xf32> to vector<8x128xf32>
    %44 = arith.addf %42, %43 : vector<8x128xf32>
    %cst_23 = arith.constant 0.000000e+00 : f32
    %45 = vector.broadcast %cst_23 : f32 to vector<8x128xf32>
    %46 = arith.maximumf %44, %45 : vector<8x128xf32>
    %cst_24 = arith.constant dense<0.000000e+00> : vector<8xf32>
    %47 = vector.multi_reduction <add>, %46, %cst_24 [1] : vector<8x128xf32> to vector<8xf32>
    %48 = vector.shape_cast %47 : vector<8xf32> to vector<8x1xf32>
    %cst_25 = arith.constant 3.125000e-02 : f32
    %49 = vector.broadcast %cst_25 : f32 to vector<8x1xf32>
    %50 = arith.mulf %48, %49 : vector<8x1xf32>
    %51 = arith.mulf %46, %46 : vector<8x128xf32>
    %cst_26 = arith.constant dense<0.000000e+00> : vector<8xf32>
    %52 = vector.multi_reduction <add>, %51, %cst_26 [1] : vector<8x128xf32> to vector<8xf32>
    %53 = vector.shape_cast %52 : vector<8xf32> to vector<8x1xf32>
    %cst_27 = arith.constant 3.125000e-02 : f32
    %54 = vector.broadcast %cst_27 : f32 to vector<8x1xf32>
    %55 = arith.mulf %53, %54 : vector<8x1xf32>
    %56 = arith.mulf %50, %50 : vector<8x1xf32>
    %57 = arith.subf %55, %56 : vector<8x1xf32>
    %cst_28 = arith.constant 9.99999974E-6 : f32
    %58 = vector.broadcast %cst_28 : f32 to vector<8x1xf32>
    %59 = arith.addf %57, %58 : vector<8x1xf32>
    %60 = math.rsqrt %59 : vector<8x1xf32>
    %61 = vector.broadcast %10 : vector<1x128xf32> to vector<8x128xf32>
    %62 = vector.broadcast %60 : vector<8x1xf32> to vector<8x128xf32>
    %63 = arith.mulf %61, %62 : vector<8x128xf32>
    %64 = vector.broadcast %50 : vector<8x1xf32> to vector<8x128xf32>
    %65 = arith.subf %46, %64 : vector<8x128xf32>
    %66 = arith.mulf %65, %63 : vector<8x128xf32>
    %67 = vector.broadcast %11 : vector<1x128xf32> to vector<8x128xf32>
    %68 = arith.addf %66, %67 : vector<8x128xf32>
    %cst_29 = arith.constant dense<0.000000e+00> : vector<8x128xf32>
    %69 = tpu.matmul %68, %5, %cst_29 {dimension_numbers = #tpu.dot_dimension_numbers<[1], [0], [0], [1], [0, 0, 1, 1], [], []>} : vector<8x128xf32>, vector<128x128xf32>, vector<8x128xf32> -> vector<8x128xf32>
    %70 = vector.broadcast %12 : vector<1x128xf32> to vector<8x128xf32>
    %71 = arith.addf %69, %70 : vector<8x128xf32>
    %c0_30 = arith.constant 0 : index
    %c0_31 = arith.constant 0 : index
    %72 = vector.load %arg3[%c0_30, %c0_31] : memref<8x128xf32, #tpu.memory_space<vmem>>, vector<8x128xf32>
    tpu.vector_store %arg3[%c0_30, %c0_31], %71 {strides = array<i32>} : memref<8x128xf32, #tpu.memory_space<vmem>>, vector<8x128xf32>,
    return
  }
}

</mosaic_0001>

<bundles_post_ra>
// kernel: idfd_forward.1
= control target key start
LH: loop header
LB: loop body
LE: loop exit
PB: predicated region body
PF: predicated region fallthrough
CT: control target
= control target key end

     0   :  { %8 = vsyncpa [#allocation3], 0  ;;  %s662_s12 = smov [#allocation2]   ;;  %s731_s0 = inlined_call_operand.vmem [shape: f32[8,24], index: 0, kind: input, shape index: {}]   ;;  %s732_s1 = inlined_call_operand.vmem [shape: f32[8,18], index: 1, kind: input, shape index: {}]   ;;  %s733_s2 = inlined_call_operand.hbm [shape: f32[312,128], index: 2, kind: input, shape index: {}]   ;;  %s734_s3 = inlined_call_operand.vmem [shape: f32[8,128], index: 3, kind: output, shape index: {}]  }
   0x1   :  { %s18_s13 = sshll.u32 %s662_s12, 4  ;;  %s638_s16 = scalar_lea.hbm %s733_s2, 4992  ;;  %s19_s13 = int_to_ptr.vmem [resolvable:$true] %s18_s13 }
   0x2   :  { %p639_p0 = scmp.ne.s32.totalorder %s733_s2, %s638_s16  ;;  %p642_p1 = scmp.lt.u32.totalorder %s638_s16, %s733_s2 }
   0x4   :  { %p644_p2 = pnand %p642_p1, %p639_p0 }
   0x6   :  { %647 = shalt.err (!%p644_p2)
}
   0x7   :  { %s648_s21 = scalar_lea.vmem %s19_s13, 4992  ;;  %p653_p4 = scmp.lt.s32.totalorder %s19_s13, %s19_s13 }
   0x8   :  { %p649_p3 = scmp.ne.s32.totalorder %s19_s13, %s648_s21  ;;  %p654_p5 = scmp.lt.s32.totalorder %s648_s21, %s648_s21 }
   0xa   :  { %p655_p6 = por %p654_p5, %p653_p4 }
   0xc   :  { %p656_p7 = pnand %p655_p6, %p649_p3 }
   0xe   :  { %659 = shalt.err (!%p656_p7)
}
   0xf   :  { %s663_s22 = smov 128   ;;  %s664_s23 = smov 8  }
  0x10   :  { %24 = dma.hbm_to_vmem [thread:$0]  %s733_s2, 4992, %s19_s13, [#allocation3], %s663_s22, %s663_s22, %s664_s23  }
  0x11   :  { %660 = dma.done.wait [#allocation3], 4992  }
  0x12   :  { %661 = vsyncadd [#allocation3], 4294962304  ;;  %v665_v0 = vmov 0.0|0.0   ;;  %vm666_vm0 = vmmov 0   ;;  %v667_v1 = vmov 0.0   ;;  %v33_v2 = vld [vmem:[#allocation2 + $0x18] sm:$0xff] }
  0x13   :  { %574 = vmatprep.subr.bf16.mxu0 %v665_v0  ;;  %577 = vmatprep.subr.bf16.mxu1 %v665_v0  ;;  %v34_v3 = vld [vmem:[#allocation2 + $0x20] sm:$0xff]  ;;  %v31_v6 = vld [vmem:[#allocation2 + $0x8] sm:$0xff]  ;;  %vm79_vm1 = vcmask 1041408   ;;  %v32_v9 = vld [vmem:[#allocation2 + $0x10] sm:$0xff]  ;;  %vm75_vm2 = vcmask 146432   ;;  %vm153_vm3 = vcmask 195584  }
  0x14   :  { %492 = vmatprep.mubr.msk.f32.mxu0 %vm666_vm0, %v667_v1  ;;  %501 = vmatprep.mubr.msk.f32.mxu1 %vm666_vm0, %v667_v1  ;;  %v30_v4 = vld [vmem:[#allocation2] sm:$0xff]  ;;  %v575_v5 = vpack.c.bf16 %v34_v3, %v33_v2  ;;  %v35_v8 = vld [vmem:[#allocation2 + $0x28] sm:$0x3]  ;;  %v36_v12 = vld [vmem:[#allocation2 + $0x30] sm:$0xff] }
  0x15   :  { %v578_v7 = vpack.c.bf16 %v31_v6, %v30_v4  ;;  %v29_v10 = vld [vmem:[%s732_s1] sm:$0xff]  ;;  %v37_v13 = vld [vmem:[#allocation2 + $0x38] sm:$0xff]  ;;  %v437_v16 = vld [vmem:[#allocation2 + $0x130] ss:$0 sm:$0xff] }
  0x16   :  { %576 = vmatpush3.bf16.msra.mxu0 %v575_v5  ;;  %v28_v11 = vld [vmem:[%s731_s0] sm:$0xff]  ;;  %v581_v14 = vpack.c.bf16 %v37_v13, %v36_v12  ;;  %v39_v25 = vld [vmem:[#allocation2 + $0x48] sm:$0xff]  ;;  %v40_v27 = vld [vmem:[#allocation2 + $0x50] sm:$0xff] }
  0x17   :  { %579 = vmatpush3.bf16.msra.mxu1 %v578_v7  ;;  %490 = vmatprep.subr.mxu0 %v667_v1  ;;  %v38_v24 = vld [vmem:[#allocation2 + $0x40] sm:$0xff]  ;;  %v41_v28 = vld [vmem:[#allocation2 + $0x58] sm:$0xff]  ;;  %v43_v31 = vld [vmem:[#allocation2 + $0x68] sm:$0xff] }
  0x18   :  { %499 = vmatprep.subr.mxu1 %v667_v1  ;;  %v584_v26 = vpack.c.bf16 %v39_v25, %v38_v24  ;;  %v587_v29 = vpack.c.bf16 %v41_v28, %v40_v27  ;;  %v42_v30 = vld [vmem:[#allocation2 + $0x60] sm:$0xff]  ;;  %v44_v33 = vld [vmem:[#allocation2 + $0x70] sm:$0xff]  ;;  %v45_v34 = vld [vmem:[#allocation2 + $0x78] sm:$0xff] }
  0x19   :  { %v590_v32 = vpack.c.bf16 %v43_v31, %v42_v30  ;;  %v593_v35 = vpack.c.bf16 %v45_v34, %v44_v33  ;;  %v46_v36 = vld [vmem:[#allocation2 + $0x80] sm:$0xff]  ;;  %v47_v37 = vld [vmem:[#allocation2 + $0x88] sm:$0xff]  ;;  %v48_v39 = vld [vmem:[#allocation2 + $0x90] sm:$0xff] }
  0x1a   :  { %491 = vmatpush3.msk.msra.mxu0 %vm79_vm1, %v35_v8  ;;  %v596_v38 = vpack.c.bf16 %v47_v37, %v46_v36  ;;  %v49_v40 = vld [vmem:[#allocation2 + $0x98] sm:$0xff]  ;;  %v50_v42 = vld [vmem:[#allocation2 + $0xa0] sm:$0xff]  ;;  %v51_v43 = vld [vmem:[#allocation2 + $0xa8] sm:$0xff] }
  0x1b   :  { %500 = vmatpush3.msra.mxu1 %v32_v9  ;;  %493 = vmatmul.mubr.msk.f32.vlgmr.msra.gmra.mrb[0].mxu0 %vm75_vm2, %v29_v10  ;;  %v599_v41 = vpack.c.bf16 %v49_v40, %v48_v39  ;;  %v602_v44 = vpack.c.bf16 %v51_v43, %v50_v42  ;;  %v438_v52 = vld [vmem:[#allocation2 + $0x131] ss:$0 sm:$0xff]  ;;  %v439_v56 = vld [vmem:[#allocation2 + $0x132] ss:$0 sm:$0xff]  ;;  %v53_v60 = vld [vmem:[#allocation2 + $0xb8] sm:$0xff] }
  0x1c   :  { %502 = vmatmul.mubr.msk.f32.vlgmr.msra.gmra.mrb[0].mxu1 %vm153_vm3, %v28_v11  ;;  %580 = vmatprep.subr.bf16.mxu0 %v665_v0  ;;  %v52_v59 = vld [vmem:[#allocation2 + $0xb0] sm:$0xff]  ;;  %v54_v5 = vld [vmem:[#allocation2 + $0xc0] sm:$0xff]  ;;  %v55_v6 = vld [vmem:[#allocation2 + $0xc8] sm:$0xff] }
  0x1d   :  { %536 = vmatprep.mubr.msk.f32.mxu0 %vm666_vm0, %v667_v1  ;;  %604 = vmatprep.subr.bf16.mxu1 %v665_v0  ;;  %v605_v61 = vpack.c.bf16 %v53_v60, %v52_v59  ;;  %v440_v62 = vld [vmem:[#allocation2 + $0x133] ss:$0 sm:$0xff]  ;;  %v608_v7 = vpack.c.bf16 %v55_v6, %v54_v5  ;;  %v57_v9 = vld [vmem:[#allocation2 + $0xd8] sm:$0xff]  ;;  %v58_v11 = vld [vmem:[#allocation2 + $0xe0] sm:$0xff] }
  0x1e   :  { %571 = vmatprep.mubr.msk.f32.mxu1 %vm666_vm0, %v667_v1  ;;  %582 = vmatpush3.bf16.msra.mxu0 %v581_v14  ;;  %v56_v8 = vld [vmem:[#allocation2 + $0xd0] sm:$0xff]  ;;  %v59_v12 = vld [vmem:[#allocation2 + $0xe8] sm:$0xff] }
  0x1f   :  { %583 = vmatprep.subr.bf16.mxu0 %v665_v0  ;;  %606 = vmatpush3.bf16.msra.mxu1 %v605_v61  ;;  %v611_v10 = vpack.c.bf16 %v57_v9, %v56_v8  ;;  %v614_v13 = vpack.c.bf16 %v59_v12, %v58_v11  ;;  %v60_v14 = vld [vmem:[#allocation2 + $0xf0] sm:$0xff]  ;;  %v67_v24 = vld [vmem:[#allocation2 + $0x128] sm:$0xff] }
  0x20   :  { %607 = vmatprep.subr.bf16.mxu1 %v665_v0  ;;  %v441_v33 = vld [vmem:[#allocation2 + $0x134] ss:$0 sm:$0xff]  ;;  %v442_v37 = vld [vmem:[#allocation2 + $0x135] ss:$0 sm:$0xff]  ;;  %v443_v40 = vld [vmem:[#allocation2 + $0x136] ss:$0 sm:$0xff] }
  0x22   :  { %585 = vmatpush3.bf16.msra.mxu0 %v584_v26 }
  0x23   :  { %586 = vmatprep.subr.bf16.mxu0 %v665_v0  ;;  %609 = vmatpush3.bf16.msra.mxu1 %v608_v7 }
  0x24   :  { %610 = vmatprep.subr.bf16.mxu1 %v665_v0 }
  0x26   :  { %588 = vmatpush3.bf16.msra.mxu0 %v587_v29 }
  0x27   :  { %589 = vmatprep.subr.bf16.mxu0 %v665_v0  ;;  %612 = vmatpush3.bf16.msra.mxu1 %v611_v10 }
  0x28   :  { %613 = vmatprep.subr.bf16.mxu1 %v665_v0 }
  0x2a   :  { %591 = vmatpush3.bf16.msra.mxu0 %v590_v32 }
  0x2b   :  { %592 = vmatprep.subr.bf16.mxu0 %v665_v0  ;;  %615 = vmatpush3.bf16.msra.mxu1 %v614_v13 }
  0x2c   :  { %616 = vmatprep.subr.bf16.mxu1 %v665_v0 }
  0x2e   :  { %594 = vmatpush3.bf16.msra.mxu0 %v593_v35 }
  0x2f   :  { %595 = vmatprep.subr.bf16.mxu0 %v665_v0 }
  0x32   :  { %597 = vmatpush3.bf16.msra.mxu0 %v596_v38 }
  0x33   :  { %598 = vmatprep.subr.bf16.mxu0 %v665_v0 }
  0x36   :  { %600 = vmatpush3.bf16.msra.mxu0 %v599_v41 }
  0x37   :  { %601 = vmatprep.subr.bf16.mxu0 %v665_v0 }
  0x3a   :  { %603 = vmatpush3.bf16.msra.mxu0 %v602_v44 }
  0xee   :  { %v149_v15 = vpop.f32.mrb[0].mxu0 }
  0xef   :  { %v223_v17 = vpop.f32.mrb[0].mxu1  ;;  %v494_v18 = vpop.f32.mrb[1].mxu0 }
  0xf0   :  { %v224_v19 = vadd.f32 %v223_v17, %v149_v15  ;;  %v503_v20 = vpop.f32.mrb[1].mxu1  ;;  %v61_v15 = vld [vmem:[#allocation2 + $0xf8] sm:$0xff]  ;;  %v62_v17 = vld [vmem:[#allocation2 + $0x100] sm:$0xff]  ;;  %v63_v18 = vld [vmem:[#allocation2 + $0x108] sm:$0xff] }
  0xf1   :  { %v64_v20 = vld [vmem:[#allocation2 + $0x110] sm:$0xff] }
  0xf2   :  { %v231_v21 = vadd.f32 %v437_v16, %v224_v19  ;;  %v617_v16 = vpack.c.bf16 %v61_v15, %v60_v14  ;;  %v620_v19 = vpack.c.bf16 %v63_v18, %v62_v17 }
  0xf4   :  { %v232_v22 = vmax.f32 %v231_v21, 0.0  ;;  %618 = vmatpush3.bf16.msra.mxu1 %v617_v16  ;;  %v65_v21 = vld [vmem:[#allocation2 + $0x118] sm:$0xff] }
  0xf5   :  { %619 = vmatprep.subr.bf16.mxu1 %v665_v0 }
  0xf6   :  { %233 = vadd.xlane.f32.xlu0 %v232_v22  ;;  %v236_v23 = vmul.f32 %v232_v22, %v232_v22 }
  0xf8   :  { %621 = vmatpush3.bf16.msra.mxu1 %v620_v19 }
  0xf9   :  { %622 = vmatprep.subr.bf16.mxu1 %v665_v0 }
  0xfa   :  { %237 = vadd.xlane.f32.xlu0 %v236_v23  ;;  %v66_v23 = vld [vmem:[#allocation2 + $0x120] sm:$0xff] }
  0xfb   :  { %v626_v25 = vpack.c.bf16 %v67_v24, %v66_v23 }
 0x183   :  { %v234_v45 = vpop.xlane.xlu0 %233 }
 0x184   :  { %v235_v46 = vmul.f32 0.03125, %v234_v45 }
 0x186   :  { %v240_v48 = vmul.f32 %v235_v46, %v235_v46  ;;  %v249_v54 = vsub.f32 %v232_v22, %v235_v46  ;;  %v623_v22 = vpack.c.bf16 %v65_v21, %v64_v20 }
 0x187   :  { %v238_v47 = vpop.xlane.xlu0 %237 }
 0x188   :  { %v239_v49 = vmul.f32 0.03125, %v238_v47  ;;  %624 = vmatpush3.bf16.msra.mxu1 %v623_v22 }
 0x189   :  { %625 = vmatprep.subr.bf16.mxu1 %v665_v0 }
 0x18a   :  { %v241_v50 = vsub.f32 %v239_v49, %v240_v48 }
 0x18c   :  { %v242_v51 = vadd.f32 1e-05, %v241_v50  ;;  %627 = vmatpush3.bf16.msra.mxu1 %v626_v25 }
 0x18e   :  { %634 = vrsqrt.f32 %v242_v51 }
 0x198   :  { %v635_v53 = vpop.eup %634 }
 0x199   :  { %v248_v55 = vmul.f32 %v635_v53, %v438_v52 }
 0x19b   :  { %v250_v57 = vmul.f32 %v249_v54, %v248_v55 }
 0x19d   :  { %v255_v58 = vadd.f32 %v439_v56, %v250_v57 }
 0x19f   :  { %537 = vmatmul.mubr.f32.vlgmr.msra.gmra.mrb[2].mxu0 %v255_v58 }
 0x272   :  { %v326_v63 = vpop.f32.mrb[2].mxu0 }
 0x273   :  { %v327_v1 = vadd.f32 %v440_v62, %v326_v63  ;;  %v538_v2 = vpop.f32.mrb[3].mxu0 }
 0x275   :  { %v330_v3 = vmax.f32 %v327_v1, 0.0 }
 0x277   :  { %331 = vadd.xlane.f32.xlu1 %v330_v3  ;;  %v334_v4 = vmul.f32 %v330_v3, %v330_v3 }
 0x27b   :  { %335 = vadd.xlane.f32.xlu1 %v334_v4 }
 0x304   :  { %v332_v26 = vpop.xlane.xlu1 %331 }
 0x305   :  { %v333_v27 = vmul.f32 0.03125, %v332_v26 }
 0x307   :  { %v338_v29 = vmul.f32 %v333_v27, %v333_v27  ;;  %v347_v35 = vsub.f32 %v330_v3, %v333_v27 }
 0x308   :  { %v336_v28 = vpop.xlane.xlu1 %335 }
 0x309   :  { %v337_v30 = vmul.f32 0.03125, %v336_v28 }
 0x30b   :  { %v339_v31 = vsub.f32 %v337_v30, %v338_v29 }
 0x30d   :  { %v340_v32 = vadd.f32 1e-05, %v339_v31 }
 0x30f   :  { %636 = vrsqrt.f32 %v340_v32 }
 0x319   :  { %v637_v34 = vpop.eup %636 }
 0x31a   :  { %v346_v36 = vmul.f32 %v637_v34, %v441_v33 }
 0x31c   :  { %v348_v38 = vmul.f32 %v347_v35, %v346_v36 }
 0x31e   :  { %v353_v39 = vadd.f32 %v442_v37, %v348_v38 }
 0x320   :  { %572 = vmatmul.mubr.f32.vlgmr.msra.gmra.mrb[2].mxu1 %v353_v39 }
 0x3f3   :  { %v424_v41 = vpop.f32.mrb[2].mxu1 }
 0x3f4   :  { %v425_v0 = vadd.f32 %v443_v40, %v424_v41  ;;  %v573_v42 = vpop.f32.mrb[3].mxu1 }
 0x3f6   :  { %428 = vst [vmem:[%s734_s3] sm:$0xff] %v425_v0 }
 0x3f7   :  { %433 = vsyncpa [#allocation3], 1 }

</bundles_post_ra>
